<compile_context>
chip_gen: v5e
topology: v5e:2x2
jax: 0.10.0
libtpu: 0.0.40
codegen_flags: <defaults>
</compile_context>

<pallas_src>
import math

import jax
import jax.numpy as jnp
from jax.experimental import pallas as pl
from jax.experimental.pallas import tpu as pltpu


def _make_kernel(G, TL):
    """Kernel over one grid step = G tiles of TL output rows each."""

    def kernel(xh_ref, pool_ref, w_ref, o_ref):
        # xh_ref:   (G, TL+6, C)  haloed x slabs (slab row j == x row start+j-3)
        # pool_ref: (G, TL,   C)  [maxpool | avgpool] features
        # w_ref:    (8, C, D)     folded weights: slots 0..6 = taps, 7 = pool
        # o_ref:    (G, TL, D)
        for g in range(G):
            slab = xh_ref[g]                                     # (TL+6, C)
            acc = jnp.dot(pool_ref[g], w_ref[7],
                          preferred_element_type=jnp.float32)    # pool branch
            for j in range(7):                                   # circular taps
                acc = acc + jnp.dot(slab[j:j + TL, :], w_ref[j],
                                    preferred_element_type=jnp.float32)
            o_ref[g] = acc.astype(o_ref.dtype)

    return kernel


def _choose_tiling(B, L):
    """Pick (TL, nT, G): time tile, tiles per sequence, tiles per grid step."""
    TL = L  # fallback: whole sequence per tile (block dim == full array dim)
    for cand in (1024, 512, 256, 128, 64, 32, 16):
        if L % cand == 0:
            TL = cand
            break
    nT = L // TL
    NT = B * nT
    # ~512 rows per grid step, but keep >= 2 steps (v7x has 2 TensorCores) and
    # cap the unrolled per-step code size; G must divide NT.
    G = max(1, min(512 // TL, 16)) if TL < 512 else 1
    G = min(G, NT)
    if NT >= 2:
        G = min(G, NT // 2)
    G = max(G, 1)
    while NT % G:
        G -= 1
    return TL, nT, G


def _shrink_for_vmem(G, TL, C, D, out_bytes, NT, budget=10 * 1024 * 1024):
    """Reduce G until double-buffered tiles fit comfortably (v5e 16 MiB scoped)."""

    def est(g):
        xh = g * (TL + 6) * C * 4
        pool = g * TL * C * 4
        out = g * TL * D * out_bytes
        w = 8 * C * D * 4
        acc = g * TL * D * 4
        return 2 * (xh + pool + out) + w + acc

    while G > 1 and est(G) > budget:
        G -= 1
        while NT % G:
            G -= 1
    return G


def series_convs_forward(x, w1, w3, w7, wp, out_dtype=jnp.bfloat16):
    """x: (B, L, enc_in); w1/w3/w7: (d_model, enc_in, k); wp: (d_model, 2C+3D, 1).

    Returns (B, L, d_model) in `out_dtype` (default bf16 for the downstream
    attention; pass jnp.float32 for a bit-faithful f32 result).
    """
    B, L, C = x.shape
    D = w1.shape[0]
    assert L % 2 == 0, "MaxPool1d/AvgPool1d(kernel_size=2) requires even L"
    assert L >= 4, "circular padding of 3 needs a non-degenerate sequence"

    f32 = jnp.float32
    x = x.astype(f32)

    # ---- trace-time weight folding: conv_proj absorbed into conv weights ----
    wp2 = wp[:, :, 0].astype(f32)                       # (D, 2C + 3D)
    wp_id = wp2[:, :C].T                                # (C, D)  identity block
    wp1 = wp2[:, C:C + D].T                             # (D, D)  conv1x block
    wp3 = wp2[:, C + D:C + 2 * D].T                     # (D, D)  conv3x block
    wp7 = wp2[:, C + 2 * D:C + 3 * D].T                 # (D, D)  conv7x block
    wp_pool = wp2[:, C + 3 * D:].T                      # (C, D)  pool block

    w1t = w1[:, :, 0].astype(f32).T                     # (C, D)
    w3t = jnp.transpose(w3.astype(f32), (2, 1, 0))      # (3, C, D)
    w7t = jnp.transpose(w7.astype(f32), (2, 1, 0))      # (7, C, D)

    # Effective weight for time-shift (j - 3), j = 0..6.
    w_eff = [w7t[j] @ wp7 for j in range(7)]            # each (C, D)
    for j in (2, 3, 4):                                 # conv3 taps: shifts -1,0,+1
        w_eff[j] = w_eff[j] + w3t[j - 2] @ wp3
    w_eff[3] = w_eff[3] + w1t @ wp1 + wp_id             # conv1 + identity, shift 0
    w_all = jnp.stack(w_eff + [wp_pool], axis=0)        # (8, C, D)

    # ---- pool features: MaxPool1d / AvgPool1d(kernel=2) concat along time ----
    # (faithful to the reference: rows < L/2 see max-pool, rows >= L/2 avg-pool)
    x_even = x[:, 0::2, :]                               # (B, L//2, C)
    x_odd = x[:, 1::2, :]                                # (B, L//2, C)
    pool_in = jnp.concatenate([jnp.maximum(x_even, x_odd),
                               0.5 * (x_even + x_odd)], axis=1)   # (B, L, C)

    # ---- tiling ----
    TL, nT, G = _choose_tiling(B, L)
    NT = B * nT
    out_bytes = jnp.dtype(out_dtype).itemsize
    G = _shrink_for_vmem(G, TL, C, D, out_bytes, NT)
    K = 8  # weight slots

    # ---- per-tile slabs with a +/-3-row circular halo (tiny: +6 rows/tile) ---
    # slab row j of tile t holds x[(t*TL + j - 3) % L]
    main = x.reshape(B, nT, TL, C)
    left3 = jnp.roll(x, 3, axis=1).reshape(B, nT, TL, C)[:, :, :3, :]
    right3 = jnp.roll(x, -3, axis=1).reshape(B, nT, TL, C)[:, :, TL - 3:, :]
    x_halo = jnp.concatenate([left3, main, right3], axis=2).reshape(NT, TL + 6, C)
    pool_t = pool_in.reshape(NT, TL, C)

    grid = (NT // G,)
    kernel = _make_kernel(G, TL)

    grid_spec = pltpu.PrefetchScalarGridSpec(
        num_scalar_prefetch=0,
        grid=grid,
        in_specs=[
            pl.BlockSpec((G, TL + 6, C), lambda i: (i, 0, 0)),
            pl.BlockSpec((G, TL, C), lambda i: (i, 0, 0)),
            # Grid-invariant folded weights (tiny: 8*C*D f32).
            pl.BlockSpec((K, C, D), lambda i: (0, 0, 0)),
        ],
        out_specs=pl.BlockSpec((G, TL, D), lambda i: (i, 0, 0)),
    )

    out = pl.pallas_call(
        kernel,
        out_shape=jax.ShapeDtypeStruct((NT, TL, D), out_dtype),
        grid_spec=grid_spec,
        compiler_params=pltpu.CompilerParams(
            dimension_semantics=("parallel",)),
    )(x_halo, pool_t, w_all)

    # Free reshape (contiguous) — no extra HBM pass, no lane-dim slice.
    return out.reshape(B, L, D)


def reference_forward(x, w1, w3, w7, wp):
    """Pure-JAX (f32) mirror of the PyTorch SeriesConvs.forward semantics."""
    B, L, C = x.shape
    xc = jnp.transpose(x, (0, 2, 1))                    # (B, C, L) == x.permute(0,2,1)

    def circ_conv(xc, w, pad):
        k = w.shape[2]
        if pad > 0:
            xp = jnp.concatenate([xc[:, :, L - pad:], xc, xc[:, :, :pad]], axis=2)
        else:
            xp = xc
        taps = jnp.stack([xp[:, :, j:j + L] for j in range(k)], axis=-1)  # (B, C, L, k)
        return jnp.einsum('ocj,bclj->bol', w, taps)

    c1 = circ_conv(xc, w1, 0)
    c3 = circ_conv(xc, w3, 1)
    c7 = circ_conv(xc, w7, 3)
    xr = xc.reshape(B, C, L // 2, 2)
    max_f = xr.max(axis=-1)
    avg_f = xr.mean(axis=-1)
    pool_f = jnp.concatenate([max_f, avg_f], axis=-1)                     # (B, C, L)
    feats = jnp.concatenate([xc, c1, c3, c7, pool_f], axis=1)             # (B, 2C+3D, L)
    out = jnp.einsum('oc,bcl->bol', wp[:, :, 0], feats)                   # (B, D, L)
    return jnp.transpose(out, (0, 2, 1))                                  # (B, L, D)


if __name__ == "__main__":
    B, L, enc_in, d_model = 2, 16, 8, 32

    key = jax.random.PRNGKey(0)
    k_x, k1, k3, k7, kp = jax.random.split(key, 5)
    x = jax.random.normal(k_x, (B, L, enc_in), dtype=jnp.float32)

    def kaiming_normal(k, shape, fan_in, a=0.01):
        # nn.init.kaiming_normal_(mode='fan_in', nonlinearity='leaky_relu')
        gain = math.sqrt(2.0 / (1.0 + a * a))
        return (gain / math.sqrt(fan_in)) * jax.random.normal(k, shape, dtype=jnp.float32)

    w1 = kaiming_normal(k1, (d_model, enc_in, 1), enc_in * 1)
    w3 = kaiming_normal(k3, (d_model, enc_in, 3), enc_in * 3)
    w7 = kaiming_normal(k7, (d_model, enc_in, 7), enc_in * 7)
    f_in = enc_in * 2 + d_model * 3
    wp = kaiming_normal(kp, (d_model, f_in, 1), f_in * 1)

    ref = reference_forward(x, w1, w3, w7, wp)

    # All-f32 path: should match the reference to accumulation-order noise.
    out_f32 = series_convs_forward(x, w1, w3, w7, wp, out_dtype=jnp.float32)
    out_f32 = jax.block_until_ready(out_f32)
    assert out_f32.shape == (B, L, d_model), out_f32.shape
    err_f32 = float(jnp.max(jnp.abs(out_f32 - ref)))
    if not bool(jnp.allclose(out_f32, ref, atol=1e-4, rtol=1e-4)):
        raise AssertionError(f"f32 kernel/reference mismatch: max abs err = {err_f32}")

    # Default bf16-output path (f32 accumulation, cast on store).
    out_bf16 = series_convs_forward(x, w1, w3, w7, wp)
    out_bf16 = jax.block_until_ready(out_bf16)
    assert out_bf16.shape == (B, L, d_model), out_bf16.shape
    out_b = out_bf16.astype(jnp.float32)
    err_b = float(jnp.max(jnp.abs(out_b - ref)))
    if not bool(jnp.allclose(out_b, ref, atol=3e-2, rtol=3e-2)):
        raise AssertionError(f"bf16 kernel/reference mismatch: max abs err = {err_b}")

    print("KERNEL_OK")
</pallas_src>

<mosaic_0001>
module attributes {stable_mosaic.version = 11 : i64} {
  func.func @kernel(%arg0: i32, %arg1: memref<1x22x8xf32, #tpu.memory_space<vmem>>, %arg2: memref<1x16x8xf32, #tpu.memory_space<vmem>>, %arg3: memref<8x8x32xf32, #tpu.memory_space<vmem>>, %arg4: memref<1x16x32xf32, #tpu.memory_space<vmem>>) attributes {dimension_semantics = [#tpu.dimension_semantics<parallel>], iteration_bounds = array<i64: 2>, scalar_prefetch = 0 : i64, scratch_operands = 0 : i64, tpu.core_type = #tpu.core_type<tc>, window_params = [{transform_indices = @transform_0, window_bounds = array<i64: 1, 22, 8>}, {transform_indices = @transform_1, window_bounds = array<i64: 1, 16, 8>}, {pipeline_mode = #tpu.pipeline_mode<synchronous>, transform_indices = @transform_2, window_bounds = array<i64: 8, 8, 32>}, {transform_indices = @transform_3, window_bounds = array<i64: 1, 16, 32>}]} {
    %c0 = arith.constant 0 : index
    %c0_0 = arith.constant 0 : index
    %c0_1 = arith.constant 0 : index
    %0 = vector.load %arg1[%c0, %c0_0, %c0_1] : memref<1x22x8xf32, #tpu.memory_space<vmem>>, vector<1x22x8xf32>
    %1 = vector.shape_cast %0 : vector<1x22x8xf32> to vector<22x8xf32>
    %c0_2 = arith.constant 0 : index
    %c0_3 = arith.constant 0 : index
    %c0_4 = arith.constant 0 : index
    %2 = vector.load %arg2[%c0_2, %c0_3, %c0_4] : memref<1x16x8xf32, #tpu.memory_space<vmem>>, vector<1x16x8xf32>
    %3 = vector.shape_cast %2 : vector<1x16x8xf32> to vector<16x8xf32>
    %c7 = arith.constant 7 : index
    %c0_5 = arith.constant 0 : index
    %c0_6 = arith.constant 0 : index
    %4 = vector.load %arg3[%c7, %c0_5, %c0_6] : memref<8x8x32xf32, #tpu.memory_space<vmem>>, vector<1x8x32xf32>
    %5 = vector.shape_cast %4 : vector<1x8x32xf32> to vector<8x32xf32>
    %cst = arith.constant dense<0.000000e+00> : vector<16x32xf32>
    %6 = tpu.matmul %3, %5, %cst {dimension_numbers = #tpu.dot_dimension_numbers<[1], [0], [0], [1], [0, 0, 1, 1], [], []>} : vector<16x8xf32>, vector<8x32xf32>, vector<16x32xf32> -> vector<16x32xf32>
    %7 = vector.extract_strided_slice %1 {offsets = [0, 0], sizes = [16, 8], strides = [1, 1]} : vector<22x8xf32> to vector<16x8xf32>
    %c0_7 = arith.constant 0 : index
    %c0_8 = arith.constant 0 : index
    %c0_9 = arith.constant 0 : index
    %8 = vector.load %arg3[%c0_7, %c0_8, %c0_9] : memref<8x8x32xf32, #tpu.memory_space<vmem>>, vector<1x8x32xf32>
    %9 = vector.shape_cast %8 : vector<1x8x32xf32> to vector<8x32xf32>
    %cst_10 = arith.constant dense<0.000000e+00> : vector<16x32xf32>
    %10 = tpu.matmul %7, %9, %cst_10 {dimension_numbers = #tpu.dot_dimension_numbers<[1], [0], [0], [1], [0, 0, 1, 1], [], []>} : vector<16x8xf32>, vector<8x32xf32>, vector<16x32xf32> -> vector<16x32xf32>
    %11 = arith.addf %6, %10 : vector<16x32xf32>
    %12 = vector.extract_strided_slice %1 {offsets = [1, 0], sizes = [16, 8], strides = [1, 1]} : vector<22x8xf32> to vector<16x8xf32>
    %c1 = arith.constant 1 : index
    %c0_11 = arith.constant 0 : index
    %c0_12 = arith.constant 0 : index
    %13 = vector.load %arg3[%c1, %c0_11, %c0_12] : memref<8x8x32xf32, #tpu.memory_space<vmem>>, vector<1x8x32xf32>
    %14 = vector.shape_cast %13 : vector<1x8x32xf32> to vector<8x32xf32>
    %cst_13 = arith.constant dense<0.000000e+00> : vector<16x32xf32>
    %15 = tpu.matmul %12, %14, %cst_13 {dimension_numbers = #tpu.dot_dimension_numbers<[1], [0], [0], [1], [0, 0, 1, 1], [], []>} : vector<16x8xf32>, vector<8x32xf32>, vector<16x32xf32> -> vector<16x32xf32>
    %16 = arith.addf %11, %15 : vector<16x32xf32>
    %17 = vector.extract_strided_slice %1 {offsets = [2, 0], sizes = [16, 8], strides = [1, 1]} : vector<22x8xf32> to vector<16x8xf32>
    %c2 = arith.constant 2 : index
    %c0_14 = arith.constant 0 : index
    %c0_15 = arith.constant 0 : index
    %18 = vector.load %arg3[%c2, %c0_14, %c0_15] : memref<8x8x32xf32, #tpu.memory_space<vmem>>, vector<1x8x32xf32>
    %19 = vector.shape_cast %18 : vector<1x8x32xf32> to vector<8x32xf32>
    %cst_16 = arith.constant dense<0.000000e+00> : vector<16x32xf32>
    %20 = tpu.matmul %17, %19, %cst_16 {dimension_numbers = #tpu.dot_dimension_numbers<[1], [0], [0], [1], [0, 0, 1, 1], [], []>} : vector<16x8xf32>, vector<8x32xf32>, vector<16x32xf32> -> vector<16x32xf32>
    %21 = arith.addf %16, %20 : vector<16x32xf32>
    %22 = vector.extract_strided_slice %1 {offsets = [3, 0], sizes = [16, 8], strides = [1, 1]} : vector<22x8xf32> to vector<16x8xf32>
    %c3 = arith.constant 3 : index
    %c0_17 = arith.constant 0 : index
    %c0_18 = arith.constant 0 : index
    %23 = vector.load %arg3[%c3, %c0_17, %c0_18] : memref<8x8x32xf32, #tpu.memory_space<vmem>>, vector<1x8x32xf32>
    %24 = vector.shape_cast %23 : vector<1x8x32xf32> to vector<8x32xf32>
    %cst_19 = arith.constant dense<0.000000e+00> : vector<16x32xf32>
    %25 = tpu.matmul %22, %24, %cst_19 {dimension_numbers = #tpu.dot_dimension_numbers<[1], [0], [0], [1], [0, 0, 1, 1], [], []>} : vector<16x8xf32>, vector<8x32xf32>, vector<16x32xf32> -> vector<16x32xf32>
    %26 = arith.addf %21, %25 : vector<16x32xf32>
    %27 = vector.extract_strided_slice %1 {offsets = [4, 0], sizes = [16, 8], strides = [1, 1]} : vector<22x8xf32> to vector<16x8xf32>
    %c4 = arith.constant 4 : index
    %c0_20 = arith.constant 0 : index
    %c0_21 = arith.constant 0 : index
    %28 = vector.load %arg3[%c4, %c0_20, %c0_21] : memref<8x8x32xf32, #tpu.memory_space<vmem>>, vector<1x8x32xf32>
    %29 = vector.shape_cast %28 : vector<1x8x32xf32> to vector<8x32xf32>
    %cst_22 = arith.constant dense<0.000000e+00> : vector<16x32xf32>
    %30 = tpu.matmul %27, %29, %cst_22 {dimension_numbers = #tpu.dot_dimension_numbers<[1], [0], [0], [1], [0, 0, 1, 1], [], []>} : vector<16x8xf32>, vector<8x32xf32>, vector<16x32xf32> -> vector<16x32xf32>
    %31 = arith.addf %26, %30 : vector<16x32xf32>
    %32 = vector.extract_strided_slice %1 {offsets = [5, 0], sizes = [16, 8], strides = [1, 1]} : vector<22x8xf32> to vector<16x8xf32>
    %c5 = arith.constant 5 : index
    %c0_23 = arith.constant 0 : index
    %c0_24 = arith.constant 0 : index
    %33 = vector.load %arg3[%c5, %c0_23, %c0_24] : memref<8x8x32xf32, #tpu.memory_space<vmem>>, vector<1x8x32xf32>
    %34 = vector.shape_cast %33 : vector<1x8x32xf32> to vector<8x32xf32>
    %cst_25 = arith.constant dense<0.000000e+00> : vector<16x32xf32>
    %35 = tpu.matmul %32, %34, %cst_25 {dimension_numbers = #tpu.dot_dimension_numbers<[1], [0], [0], [1], [0, 0, 1, 1], [], []>} : vector<16x8xf32>, vector<8x32xf32>, vector<16x32xf32> -> vector<16x32xf32>
    %36 = arith.addf %31, %35 : vector<16x32xf32>
    %37 = vector.extract_strided_slice %1 {offsets = [6, 0], sizes = [16, 8], strides = [1, 1]} : vector<22x8xf32> to vector<16x8xf32>
    %c6 = arith.constant 6 : index
    %c0_26 = arith.constant 0 : index
    %c0_27 = arith.constant 0 : index
    %38 = vector.load %arg3[%c6, %c0_26, %c0_27] : memref<8x8x32xf32, #tpu.memory_space<vmem>>, vector<1x8x32xf32>
    %39 = vector.shape_cast %38 : vector<1x8x32xf32> to vector<8x32xf32>
    %cst_28 = arith.constant dense<0.000000e+00> : vector<16x32xf32>
    %40 = tpu.matmul %37, %39, %cst_28 {dimension_numbers = #tpu.dot_dimension_numbers<[1], [0], [0], [1], [0, 0, 1, 1], [], []>} : vector<16x8xf32>, vector<8x32xf32>, vector<16x32xf32> -> vector<16x32xf32>
    %41 = arith.addf %36, %40 : vector<16x32xf32>
    %c0_29 = arith.constant 0 : index
    %c0_30 = arith.constant 0 : index
    %c0_31 = arith.constant 0 : index
    %42 = vector.load %arg4[%c0_29, %c0_30, %c0_31] : memref<1x16x32xf32, #tpu.memory_space<vmem>>, vector<1x16x32xf32>
    %43 = vector.shape_cast %42 : vector<1x16x32xf32> to vector<16x32xf32>
    %44 = vector.shape_cast %41 : vector<16x32xf32> to vector<1x16x32xf32>
    tpu.vector_store %arg4[%c0_29, %c0_30, %c0_31], %44 {strides = array<i32>} : memref<1x16x32xf32, #tpu.memory_space<vmem>>, vector<1x16x32xf32>,
    return
  }
  func.func @transform_0(%arg0: i32) -> (i32, i32, i32) {
    %c0_i32 = arith.constant 0 : i32
    %c0_i32_0 = arith.constant 0 : i32
    %c0_i32_1 = arith.constant 0 : i32
    return %arg0, %c0_i32, %c0_i32_0 : i32, i32, i32
  }
  func.func @transform_1(%arg0: i32) -> (i32, i32, i32) {
    %c0_i32 = arith.constant 0 : i32
    %c0_i32_0 = arith.constant 0 : i32
    %c0_i32_1 = arith.constant 0 : i32
    return %arg0, %c0_i32, %c0_i32_0 : i32, i32, i32
  }
  func.func @transform_2(%arg0: i32) -> (i32, i32, i32) {
    %c0_i32 = arith.constant 0 : i32
    %c0_i32_0 = arith.constant 0 : i32
    %c0_i32_1 = arith.constant 0 : i32
    %c0_i32_2 = arith.constant 0 : i32
    return %c0_i32, %c0_i32_0, %c0_i32_1 : i32, i32, i32
  }
  func.func @transform_3(%arg0: i32) -> (i32, i32, i32) {
    %c0_i32 = arith.constant 0 : i32
    %c0_i32_0 = arith.constant 0 : i32
    %c0_i32_1 = arith.constant 0 : i32
    return %arg0, %c0_i32, %c0_i32_0 : i32, i32, i32
  }
}

</mosaic_0001>

<bundles_post_ra>
// kernel: tpu_custom_call.1
= control target key start
LH: loop header
LB: loop body
LE: loop exit
PB: predicated region body
PF: predicated region fallthrough
CT: control target
= control target key end

     0   :  { %8 = vsyncpa [#allocation3], 0  ;;  %s880_s0 = inlined_call_operand.vmem [shape: f32[2,22,8], index: 0, kind: input, shape index: {}]   ;;  %s881_s1 = inlined_call_operand.vmem [shape: f32[2,16,8], index: 1, kind: input, shape index: {}]   ;;  %s882_s2 = inlined_call_operand.vmem [shape: f32[8,8,32], index: 2, kind: input, shape index: {}]   ;;  %s883_s3 = inlined_call_operand.hbm [shape: f32[2,16,32], index: 3, kind: output, shape index: {}]  }
   0x1   :  { %10 = vsyncpa [#allocation3 + $0x1], 0  ;;  %s738_s12 = smov 0   ;;  %s740_s13 = smov 0  }
   0x2   :  { %s742_s14 = smov 0   ;;  %s744_s15 = smov 0  }
   0x3 LB: > { %s759_s16 = sadd.s32 4294967295, %s714_s15   ;;  %s572_s17 = sadd.s32 4294967294, %s714_s15   ;;  %s714_s15 = sphi %s744_s15, %s889_s15   ;;  %s710_s14 = sphi %s742_s14, %s888_s14   ;;  %s706_s13 = sphi %s740_s13, %s887_s13   ;;  %s702_s12 = sphi %s738_s12, %s886_s12  }
   0x4   : > { %s763_s18 = sadd.s32 1, %s714_s15   ;;  %s96_s19 = sadd.s32 1, %s710_s14 }
   0x5   : > { %s93_s20 = ssub.s32 %s714_s15, %s763_s18  ;;  %p106_p0 = scmp.ne.s32.totalorder %s710_s14, %s706_s13 }
   0x6   : > { %p94_p1 = scmp.eq.s32.totalorder %s93_s20, 0  ;;  %p107_p2 = scmp.eq.s32.totalorder %s759_s16, 1 }
   0x7   : > { %p112_p3 = scmp.ne.s32.totalorder %s706_s13, %s702_s12  ;;  %p113_p4 = scmp.eq.s32.totalorder %s572_s17, 1 }
   0x8   : > { %s774_s21 = scalar_select %p94_p1, %s710_s14, %s96_s19  }
   0x9   : > { %p776_p5 = por %p107_p2, %p106_p0  ;;  %p780_p6 = por %p113_p4, %p112_p3 }
   0xa   : > { %p575_p7 = scmp.ge.s32.totalorder %s714_s15, 1  ;;  %p150_p8 = scmp.lt.s32.totalorder %s714_s15, 3 }
   0xc   : > { %p151_p9 = pnand %p575_p7, %p150_p8 }
   0xd   : > { %p179_p10 = scmp.lt.s32.totalorder (!%p151_p9), %s759_s16, 1  ;;  %s176_s4 = sand.u32 (!%p151_p9), 1, %s706_s13  }
   0xe   : > { %154 = sbr.rel (%p151_p9) target bundleno = 192 (0xc0), region = 32  ;;  %s576_s5 = sshll.u32 (!%p151_p9), %s176_s4, 4 }
   0xf   : > { %s609_s6 = sshll.u32 (!%p151_p9), %s759_s16, 4  ;;  %s178_s10 = scalar_lea.vmem (!%p151_p9), [#allocation2], %s576_s5 }
  0x10   : > { %s495_s11 = sshll.u32 (!%p151_p9), %s178_s10, 4  ;;  %s672_s26 = scalar_lea.hbm (!%p151_p9), %s883_s3, 32  ;;  %s496_s11 = int_to_ptr.vmem [resolvable:$true] %s495_s11 }
  0x13   : > { %v196_v0 = vld [vmem:[%s882_s2] sm:$0xff]  ;;  %v580_v1 = vld [vmem:[%s882_s2 + $0x38] sm:$0xff]  ;;  %v585_v2 = vld [vmem:[%s882_s2 + $0x8] sm:$0xff]  ;;  %s180_s9 = scalar_select %p179_p10, %s759_s16, 1  ;;  %vm197_vm0 = vcmask 64512   ;;  %vm259_vm1 = vcmask 1046528  }
  0x14   : > { %219 = vmatpush.msra.mxu0 %v196_v0  ;;  %248 = vmatpush.msra.mxu1 %v580_v1  ;;  %v597_v3 = vld [vmem:[%s882_s2 + $0x28] sm:$0xff]  ;;  %v588_v4 = vld [vmem:[%s882_s2 + $0x10] sm:$0xff]  ;;  %v591_v5 = vld [vmem:[%s882_s2 + $0x18] sm:$0xff]  ;;  %vm296_vm2 = vcmask 1045504   ;;  %vm370_vm3 = vcmask 1043456   ;;  %vm333_vm4 = vcmask 1044480  }
  0x15   : > { %284 = vmatpush.msra.mxu2 %v585_v2  ;;  %321 = vmatpush.msra.mxu3 %v588_v4  ;;  %v600_v6 = vld [vmem:[%s882_s2 + $0x30] sm:$0xff]  ;;  %v594_v7 = vld [vmem:[%s882_s2 + $0x20] sm:$0xff]  ;;  %s610_s20 = smul.u32 24, %s180_s9  ;;  %s608_s24 = sshll.u32 %s180_s9, 4  ;;  %vm407_vm5 = vcmask 1042432   ;;  %vm444_vm6 = vcmask 1041408  }
  0x16   : > { %358 = vmatpush.msrb.mxu0 %v591_v5  ;;  %395 = vmatpush.msrb.mxu1 %v594_v7  ;;  %s188_s27 = scalar_lea.vmem %s881_s1, %s608_s24  ;;  %vm479_vm7 = vcmask 261120   ;;  %s494_s9 = scalar_lea.hbm %s883_s3, %s609_s6 }
  0x17   : > { %432 = vmatpush.msrb.mxu2 %v597_v3  ;;  %469 = vmatpush.msrb.mxu3 %v600_v6  ;;  %s183_s30 = scalar_lea.vmem %s880_s0, %s610_s20  ;;  %v192_v8 = vld [vmem:[%s188_s27] sm:$0xff]  ;;  %v193_v18 = vld [vmem:[%s188_s27 + $0x8] sm:$0xff]  ;;  %s497_s17 = sshll.u32 %s494_s9, 4  ;;  %s498_s17 = int_to_ptr.hbm [resolvable:$true] %s497_s17 }
  0x18   : > { %v189_v9 = vld [vmem:[%s183_s30] sm:$0xff]  ;;  %v190_v10 = vld [vmem:[%s183_s30 + $0x8] sm:$0xff]  ;;  %583 = vmatmul.msk.f32.vlgmr.msra.gmra.mxu1 %vm197_vm0, %v192_v8  ;;  %v191_v15 = vld [vmem:[%s183_s30 + $0x10] sm:$0x3f]  ;;  %s483_s16 = scalar_lea.sflag [#allocation3], %s176_s4  ;;  %s666_s19 = sshra.s32 %s498_s17, 4  ;;  %s667_s19 = int_to_ptr.hbm [resolvable:$true] %s666_s19 }
  0x19   : > { %581 = vmatmul.msk.f32.vlgmr.msra.gmra.mxu0 %vm197_vm0, %v189_v9  ;;  %v260_v11 = vrot.slane %v189_v9, 1  ;;  %v261_v12 = vrot.slane %v190_v10, 1  ;;  %v297_v13 = vrot.slane %v189_v9, 2  ;;  %v298_v14 = vrot.slane %v190_v10, 2  ;;  %s668_s20 = scalar_lea.hbm %s667_s19, 16  ;;  %p673_p0 = scmp.lt.s32.totalorder %s667_s19, %s883_s3 }
  0x1a   : > { %v263_v19 = vrot.slane %v191_v15, 1  ;;  %v300_v20 = vrot.slane %v191_v15, 2  ;;  %v371_v23 = vrot.slane %v189_v9, 4  ;;  %v372_v24 = vrot.slane %v190_v10, 4  ;;  %p669_p11 = scmp.ne.s32.totalorder %s667_s19, %s668_s20  ;;  %p674_p1 = scmp.lt.s32.totalorder %s672_s26, %s668_s20 }
  0x1b   : > { %v262_v16 = vsel %vm259_vm1, %v260_v11, %v261_v12  ;;  %v299_v17 = vsel %vm296_vm2, %v297_v13, %v298_v14  ;;  %v334_v25 = vrot.slane %v189_v9, 3  ;;  %v335_v26 = vrot.slane %v190_v10, 3 }
  0x1c   : > { %586 = vmatmul.msk.f32.vlgmr.msra.gmra.mxu2 %vm197_vm0, %v262_v16  ;;  %589 = vmatmul.msk.f32.vlgmr.msra.gmra.mxu3 %vm197_vm0, %v299_v17  ;;  %v264_v21 = vsel %vm259_vm1, %v261_v12, %v263_v19  ;;  %v301_v22 = vsel %vm296_vm2, %v298_v14, %v300_v20  ;;  %v408_v27 = vrot.slane %v189_v9, 5  ;;  %v373_v28 = vsel %vm370_vm3, %v371_v23, %v372_v24  ;;  %p670_p12 = pnand %p669_p11, %p776_p5  ;;  %p675_p2 = por %p674_p1, %p673_p0 }
  0x1d   : > { %v409_v29 = vrot.slane %v190_v10, 5  ;;  %v445_v30 = vrot.slane %v189_v9, 6  ;;  %v446_v31 = vrot.slane %v190_v10, 6  ;;  %v336_v32 = vsel %vm333_vm4, %v334_v25, %v335_v26 }
  0x1e   : > { %v374_v35 = vrot.slane %v191_v15, 4  ;;  %v337_v36 = vrot.slane %v191_v15, 3  ;;  %v411_v38 = vrot.slane %v191_v15, 5  ;;  %v448_v39 = vrot.slane %v191_v15, 6  ;;  %p671_p13 = pneg %p670_p12 }
  0x1f   : > { %v410_v33 = vsel %vm407_vm5, %v408_v27, %v409_v29  ;;  %v447_v34 = vsel %vm444_vm6, %v445_v30, %v446_v31 }
  0x20   : > { %584 = vmatmul.msk.f32.gmra.mxu1 %vm197_vm0, %v193_v18  ;;  %v375_v37 = vsel %vm370_vm3, %v372_v24, %v374_v35  ;;  %v338_v40 = vsel %vm333_vm4, %v335_v26, %v337_v36  ;;  %v412_v41 = vsel %vm407_vm5, %v409_v29, %v411_v38  ;;  %v449_v42 = vsel %vm444_vm6, %v446_v31, %v448_v39  ;;  %p676_p3 = pnand %p675_p2, %p671_p13 }
  0x21   : > { %582 = vmatmul.msk.f32.gmra.mxu0 %vm197_vm0, %v190_v10 }
  0x24   : > { %587 = vmatmul.msk.f32.gmra.mxu2 %vm197_vm0, %v264_v21  ;;  %590 = vmatmul.msk.f32.gmra.mxu3 %vm197_vm0, %v301_v22 }
  0x28   : > { %595 = vmatmul.msk.f32.vlgmr.msrb.gmra.mxu1 %vm197_vm0, %v373_v28 }
  0x29   : > { %592 = vmatmul.msk.f32.vlgmr.msrb.gmra.mxu0 %vm197_vm0, %v336_v32 }
  0x2c   : > { %598 = vmatmul.msk.f32.vlgmr.msrb.gmra.mxu2 %vm197_vm0, %v410_v33  ;;  %601 = vmatmul.msk.f32.vlgmr.msrb.gmra.mxu3 %vm197_vm0, %v447_v34 }
  0x30   : > { %596 = vmatmul.msk.f32.gmra.mxu1 %vm197_vm0, %v375_v37 }
  0x31   : > { %593 = vmatmul.msk.f32.gmra.mxu0 %vm197_vm0, %v338_v40 }
  0x34   : > { %599 = vmatmul.msk.f32.gmra.mxu2 %vm197_vm0, %v412_v41  ;;  %602 = vmatmul.msk.f32.gmra.mxu3 %vm197_vm0, %v449_v42 }
  0x95   : > { %v250_v43 = vpop.f32.mrf.mxu1 }
  0x96   : > { %v221_v44 = vpop.f32.mrf.mxu0 }
  0x97   : > { %v251_v49 = vadd.f32 %v250_v43, %v221_v44 }
  0x9d   : > { %v253_v46 = vpop.f32.mrf.mxu1 }
  0x9e   : > { %v224_v45 = vpop.f32.mrf.mxu0 }
  0x9f   : > { %v286_v47 = vpop.f32.mrf.mxu2  ;;  %v323_v48 = vpop.f32.mrf.mxu3  ;;  %v254_v56 = vadd.f32 %v253_v46, %v224_v45 }
  0xa0   : > { %v292_v50 = vadd.f32 %v286_v47, %v251_v49 }
  0xa2   : > { %v329_v54 = vadd.f32 %v323_v48, %v292_v50 }
  0xa5   : > { %v397_v55 = vpop.f32.mrf.mxu1 }
  0xa6   : > { %v360_v51 = vpop.f32.mrf.mxu0 }
  0xa7   : > { %v289_v52 = vpop.f32.mrf.mxu2  ;;  %v326_v53 = vpop.f32.mrf.mxu3  ;;  %v366_v57 = vadd.f32 %v360_v51, %v329_v54 }
  0xa8   : > { %v293_v58 = vadd.f32 %v289_v52, %v254_v56 }
  0xa9   : > { %v403_v59 = vadd.f32 %v397_v55, %v366_v57 }
  0xaa   : > { %v330_v63 = vadd.f32 %v326_v53, %v293_v58 }
  0xad   : > { %v400_v3 = vpop.f32.mrf.mxu1 }
  0xae   : > { %v363_v60 = vpop.f32.mrf.mxu0 }
  0xaf   : > { %v434_v61 = vpop.f32.mrf.mxu2  ;;  %v471_v62 = vpop.f32.mrf.mxu3  ;;  %v367_v1 = vadd.f32 %v363_v60, %v330_v63 }
  0xb0   : > { %v440_v0 = vadd.f32 %v434_v61, %v403_v59 }
  0xb1   : > { %v404_v4 = vadd.f32 %v400_v3, %v367_v1 }
  0xb2   : > { %v477_v2 = vadd.f32 %v471_v62, %v440_v0 }
  0xb4   : > { %480 = vst.msk [vmem:[%s178_s10] sm:$0xff] %vm479_vm7, %v477_v2 }
  0xb7   : > { %v437_v5 = vpop.f32.mrf.mxu2  ;;  %v474_v6 = vpop.f32.mrf.mxu3 }
  0xb8   : > { %v441_v7 = vadd.f32 %v437_v5, %v404_v4 }
  0xba   : > { %v478_v8 = vadd.f32 %v474_v6, %v441_v7 }
  0xbc   : > { %481 = vst.msk [vmem:[%s178_s10 + $0x8] sm:$0xff] %vm479_vm7, %v478_v8 }
  0xbd   : > { %679 = shalt.err (!%p676_p3)
}
  0xbe   : > { %s716_s29 = smov 128   ;;  %s717_s30 = smov 8  }
  0xbf   : > { %611 = dma.vmem_to_hbm [thread:$0]  (%p776_p5), %s496_s11, 256, %s498_s17, %s483_s16, %s716_s29, %s716_s29, %s717_s30  }
  0xc0 PF: > { %p617_p4 = scmp.ge.s32.totalorder %s714_s15, 2  ;;  %s512_s4 = sand.u32 1, %s702_s12  }
  0xc1   : > { %s513_s5 = scalar_lea.sflag [#allocation3], %s512_s4 }
  0xc2   : > { %p614_p7 = pnand %p617_p4, %p780_p6 }
  0xc4   : > { %p615_p8 = pneg %p614_p7 }
  0xc6   : > { %697 = dma.done.wait (%p615_p8), %s513_s5, 256  }
  0xc7   : > { %699 = vsyncadd (%p615_p8), %s513_s5, 4294967040  ;;  %p13_p9 = scmp.ge.s32.totalorder %s763_s18, 4   ;;  %s886_s12 = smov %s706_s13 }
  0xc8   : > { %s887_s13 = smov %s710_s14  ;;  %s888_s14 = smov %s774_s21 }
  0xc9   : > { %s889_s15 = smov %s763_s18  ;;  %15 = sbr.rel (!%p13_p9) target bundleno = 3 (0x3), region = 77 }
  0xce   :  { %519 = vsyncpa [#allocation3], 1 }
  0xcf   :  { %521 = vsyncpa [#allocation3 + $0x1], 1 }

</bundles_post_ra>
